<compile_context>
chip_gen: v6e
topology: v6e:2x2x1
jax: 0.10.0
libtpu: 0.0.40
codegen_flags: <defaults>
</compile_context>

<pallas_src>
import functools

import jax
import jax.numpy as jnp
from jax.experimental import pallas as pl
from jax.experimental.pallas import tpu as pltpu


def _round_up(x, m):
    return ((x + m - 1) // m) * m


# -----------------------------------------------------------------------------
# Kernel
# -----------------------------------------------------------------------------
def _mlp_fused_kernel(*refs, num_layers):
    """refs = (x_ref, w_0, b_0, ..., w_{L-1}, b_{L-1}, o_ref). All VMEM tiles.

    Activations are carried as values through a statically-unrolled layer loop,
    so no intermediate ever round-trips through HBM.
    """
    x_ref = refs[0]
    o_ref = refs[1 + 2 * num_layers]
    h = x_ref[...].astype(jnp.float32)
    for i in range(num_layers):
        w = refs[1 + 2 * i][...]
        b = refs[2 + 2 * i][...]
        # MXU matmul (optionally bf16 operands) with f32 accumulation,
        # then f32 bias-add + ReLU on the VPU.
        h = jnp.dot(h.astype(w.dtype), w, preferred_element_type=jnp.float32) + b
        h = jnp.maximum(h, 0.0)
    o_ref[...] = h.astype(o_ref.dtype)


# -----------------------------------------------------------------------------
# Tiling / VMEM budgeting
# -----------------------------------------------------------------------------
def _choose_batch_tiling(batch):
    """Pick (padded_batch, batch_tile).

    * batch < 256 (padded): one tile — small problems are latency bound.
    * batch >= 256: target 512-row tiles (measured 85%+ HBM roofline on v6e vs
      ~63% at 256), but always produce >= 2 grid steps so v7x's two TensorCores
      can split the "parallel" batch axis.
    """
    b8 = _round_up(batch, 8)
    if b8 < 256:
        return b8, b8
    tb = min(512, _round_up((b8 + 1) // 2, 8))
    return _round_up(b8, tb), tb


def _vmem_budget_bytes():
    """Generation-aware per-core VMEM budget (leave ~25% headroom)."""
    cap = None
    try:
        cap = pltpu.get_tpu_info().vmem_capacity_bytes
    except Exception:
        cap = None
    if not cap:
        cap = 64 * 1024 * 1024  # conservative: v7x has 64 MiB per TensorCore
    return int(cap) * 3 // 4


def _vmem_footprint_bytes(padded_params, batch_tile, din0_pad):
    """Estimate kernel VMEM use: single-buffered resident weights/biases,
    double-buffered activation in/out tiles, plus intermediate h temporaries."""
    w_bytes = 0
    for (w, b) in padded_params:
        w_bytes += w.size * w.dtype.itemsize + b.size * b.dtype.itemsize
    dims = [din0_pad] + [w.shape[1] for (w, _) in padded_params]
    act_in = 2 * batch_tile * din0_pad * 4
    act_out = 2 * batch_tile * dims[-1] * 4
    h_tmp = 2 * batch_tile * max(dims) * 4
    return w_bytes + act_in + act_out + h_tmp


# -----------------------------------------------------------------------------
# pallas_call wrapper
# -----------------------------------------------------------------------------
def _mlp_pallas(obs_p, padded_params, *, batch_tile, vmem_limit_bytes):
    num_layers = len(padded_params)
    b_pad, din_pad = obs_p.shape
    dout_pad = padded_params[-1][0].shape[1]
    grid = (b_pad // batch_tile,)

    in_specs = [pl.BlockSpec((batch_tile, din_pad), lambda i: (i, 0))]
    flat_inputs = [obs_p]
    for (w, b) in padded_params:
        # Constant index_map -> resident in VMEM across batch tiles, no re-DMA.
        # Buffered(1): no point double-buffering something never re-fetched.
        in_specs.append(
            pl.BlockSpec(w.shape, lambda i: (0, 0), pipeline_mode=pl.Buffered(1)))
        in_specs.append(
            pl.BlockSpec(b.shape, lambda i: (0, 0), pipeline_mode=pl.Buffered(1)))
        flat_inputs.append(w)
        flat_inputs.append(b)

    kernel = functools.partial(_mlp_fused_kernel, num_layers=num_layers)
    return pl.pallas_call(
        kernel,
        out_shape=jax.ShapeDtypeStruct((b_pad, dout_pad), jnp.float32),
        grid_spec=pltpu.PrefetchScalarGridSpec(
            num_scalar_prefetch=0,
            grid=grid,
            in_specs=in_specs,
            out_specs=pl.BlockSpec((batch_tile, dout_pad), lambda i: (i, 0)),
        ),
        compiler_params=pltpu.CompilerParams(
            # Batch tiles are independent -> shard across v7x's 2 TensorCores.
            dimension_semantics=("parallel",),
            vmem_limit_bytes=int(vmem_limit_bytes),
        ),
    )(*flat_inputs)


def _xla_fallback(obs, padded_params, *, din0_pad, out_dim):
    """Plain-jnp path (tiny problems / VMEM-overflow fallback)."""
    batch, obs_dim = obs.shape
    h = jnp.pad(obs, ((0, 0), (0, din0_pad - obs_dim)))
    for (w, b) in padded_params:
        h = jnp.dot(h.astype(w.dtype), w, preferred_element_type=jnp.float32) + b
        h = jnp.maximum(h, 0.0)
    return h[:, :out_dim]


# -----------------------------------------------------------------------------
# Public forward
# -----------------------------------------------------------------------------
@functools.partial(jax.jit, static_argnames=("out_dim", "force_pallas"))
def mlp_forward(padded_params, obs, *, out_dim, force_pallas=False):
    """Forward pass: every hidden layer is Linear followed by ReLU (per spec,
    the final Linear is also followed by its activation)."""
    batch, obs_dim = obs.shape
    din0_pad = padded_params[0][0].shape[0]

    # Tiny problems are launch/latency bound -> let XLA handle them unless the
    # caller explicitly wants the fused kernel (e.g. testing).
    all_dims_pad = [din0_pad] + [w.shape[1] for (w, _) in padded_params]
    tiny = (batch <= 64) and (max(all_dims_pad) <= 128)
    if tiny and not force_pallas:
        return _xla_fallback(obs, padded_params, din0_pad=din0_pad, out_dim=out_dim)

    b_pad, batch_tile = _choose_batch_tiling(batch)

    budget = _vmem_budget_bytes()
    # Shrink batch tile until the resident-weights footprint fits per-core VMEM.
    while (batch_tile > 8 and
           _vmem_footprint_bytes(padded_params, batch_tile, din0_pad) > budget):
        batch_tile = _round_up(batch_tile // 2, 8)
        b_pad = _round_up(batch, batch_tile)
    footprint = _vmem_footprint_bytes(padded_params, batch_tile, din0_pad)
    if footprint > budget:
        # TODO(synk): stream the widest layer's weights over their output-feature
        # dim (pltpu.emit_pipeline) instead of falling back to XLA when the
        # all-resident design does not fit per-TensorCore VMEM (v7x, 64 MiB/TC).
        return _xla_fallback(obs, padded_params, din0_pad=din0_pad, out_dim=out_dim)

    vmem_limit = min(budget, max(footprint * 5 // 4 + (1 << 20), 16 << 20))

    obs_p = jnp.pad(obs, ((0, b_pad - batch), (0, din0_pad - obs_dim)))
    out_p = _mlp_pallas(obs_p, padded_params,
                        batch_tile=batch_tile, vmem_limit_bytes=vmem_limit)
    return out_p[:batch, :out_dim]


# -----------------------------------------------------------------------------
# Parameter construction (init-time, not in the hot path)
# -----------------------------------------------------------------------------
def prepare_mlp_params(params, *, dtype=jnp.float32):
    """Pad params ONCE to lane-dense shapes (128-multiples); optionally store
    weights in bf16 for v6e/v7x MXUs (breaks 1e-5 tolerance -> keep f32 here).
    Zero padding is numerically transparent (ReLU(0)=0; padded cols sliced off).
    Returns (padded_params, out_dim)."""
    padded = []
    for (w, b) in params:
        din, dout = w.shape
        din_p = _round_up(din, 128)
        dout_p = _round_up(dout, 128)
        w_p = jnp.pad(w, ((0, din_p - din), (0, dout_p - dout))).astype(dtype)
        b_p = jnp.pad(b, ((0, 0), (0, dout_p - dout))).astype(jnp.float32)
        padded.append((w_p, b_p))
    out_dim = params[-1][0].shape[1]
    return padded, out_dim


def orthogonal_init(key, shape, gain=1.0):
    """Orthogonal init matching nn.init.orthogonal_ semantics.
    shape = (out_features, in_features) like PyTorch's Linear.weight."""
    rows, cols = shape
    flat = jax.random.normal(key, (rows, cols), dtype=jnp.float32)
    if rows < cols:
        flat = flat.T
    q, r = jnp.linalg.qr(flat)
    d = jnp.sign(jnp.diag(r))
    d = jnp.where(d == 0, 1.0, d)  # robustness: never zero out a column of Q
    q = q * d[None, :]
    if rows < cols:
        q = q.T
    return gain * q  # (out, in)


def mlp_init_params(key, obs_dim, hidden_sizes):
    """Deterministic params: orthogonal weights (gain=1.0), zero biases."""
    # TODO(synk): hidden_acts other than ReLU are not supported in the fused kernel.
    sizes = [obs_dim] + list(hidden_sizes)
    params = []
    for i in range(len(sizes) - 1):
        key, sub = jax.random.split(key)
        w_pt = orthogonal_init(sub, (sizes[i + 1], sizes[i]), gain=1.0)  # (out, in)
        w = jnp.asarray(w_pt.T)                       # store as (in, out)
        b = jnp.zeros((1, sizes[i + 1]), jnp.float32)
        params.append((w, b))
    return params


if __name__ == "__main__":
    key = jax.random.PRNGKey(0)

    # --- Small example matching the module spec: batch=2, obs_dim=16, hidden=[32,32]
    obs_dim, hidden_sizes, batch = 16, [32, 32], 2
    pkey, xkey, key = jax.random.split(key, 3)
    params = mlp_init_params(pkey, obs_dim, hidden_sizes)
    padded_params, out_dim = prepare_mlp_params(params)          # pad ONCE at init
    obs = jax.random.normal(xkey, (batch, obs_dim), dtype=jnp.float32)

    # force_pallas=True: exercise the fused kernel even in the tiny regime.
    out = mlp_forward(padded_params, obs, out_dim=out_dim, force_pallas=True)
    jax.block_until_ready(out)

    ref = obs
    for (w, b) in params:
        ref = jnp.maximum(ref @ w + b, 0.0)
    assert out.shape == (batch, hidden_sizes[-1])
    assert jnp.allclose(out, ref, atol=1e-5, rtol=1e-5)

    # --- Larger check exercising the multi-tile / parallel batch-grid path
    obs_dim2, hidden2, batch2 = 40, [256, 64], 300
    pkey2, xkey2 = jax.random.split(key)
    params2 = mlp_init_params(pkey2, obs_dim2, hidden2)
    padded2, out_dim2 = prepare_mlp_params(params2)
    obs2 = jax.random.normal(xkey2, (batch2, obs_dim2), dtype=jnp.float32)

    out2 = mlp_forward(padded2, obs2, out_dim=out_dim2)
    jax.block_until_ready(out2)

    ref2 = obs2
    for (w, b) in params2:
        ref2 = jnp.maximum(ref2 @ w + b, 0.0)
    assert out2.shape == (batch2, hidden2[-1])
    assert jnp.allclose(out2, ref2, atol=1e-4, rtol=1e-4)

    print("KERNEL_OK")
</pallas_src>

<mosaic_0001>
module attributes {stable_mosaic.version = 11 : i64} {
  func.func @_mlp_fused_kernel(%arg0: i32, %arg1: memref<8x128xf32, #tpu.memory_space<vmem>>, %arg2: memref<128x128xf32, #tpu.memory_space<vmem>>, %arg3: memref<1x128xf32, #tpu.memory_space<vmem>>, %arg4: memref<128x128xf32, #tpu.memory_space<vmem>>, %arg5: memref<1x128xf32, #tpu.memory_space<vmem>>, %arg6: memref<8x128xf32, #tpu.memory_space<vmem>>) attributes {dimension_semantics = [#tpu.dimension_semantics<parallel>], iteration_bounds = array<i64: 1>, scalar_prefetch = 0 : i64, scratch_operands = 0 : i64, tpu.core_type = #tpu.core_type<tc>, window_params = [{transform_indices = @transform_0, window_bounds = array<i64: 8, 128>}, {pipeline_mode = #tpu.pipeline_mode<synchronous>, transform_indices = @transform_1, window_bounds = array<i64: 128, 128>}, {pipeline_mode = #tpu.pipeline_mode<synchronous>, transform_indices = @transform_2, window_bounds = array<i64: 1, 128>}, {pipeline_mode = #tpu.pipeline_mode<synchronous>, transform_indices = @transform_3, window_bounds = array<i64: 128, 128>}, {pipeline_mode = #tpu.pipeline_mode<synchronous>, transform_indices = @transform_4, window_bounds = array<i64: 1, 128>}, {transform_indices = @transform_5, window_bounds = array<i64: 8, 128>}]} {
    %c0 = arith.constant 0 : index
    %c0_0 = arith.constant 0 : index
    %0 = vector.load %arg1[%c0, %c0_0] : memref<8x128xf32, #tpu.memory_space<vmem>>, vector<8x128xf32>
    %c0_1 = arith.constant 0 : index
    %c0_2 = arith.constant 0 : index
    %1 = vector.load %arg2[%c0_1, %c0_2] : memref<128x128xf32, #tpu.memory_space<vmem>>, vector<128x128xf32>
    %c0_3 = arith.constant 0 : index
    %c0_4 = arith.constant 0 : index
    %2 = vector.load %arg3[%c0_3, %c0_4] : memref<1x128xf32, #tpu.memory_space<vmem>>, vector<1x128xf32>
    %cst = arith.constant dense<0.000000e+00> : vector<8x128xf32>
    %3 = tpu.matmul %0, %1, %cst {dimension_numbers = #tpu.dot_dimension_numbers<[1], [0], [0], [1], [0, 0, 1, 1], [], []>} : vector<8x128xf32>, vector<128x128xf32>, vector<8x128xf32> -> vector<8x128xf32>
    %4 = vector.broadcast %2 : vector<1x128xf32> to vector<8x128xf32>
    %5 = arith.addf %3, %4 : vector<8x128xf32>
    %cst_5 = arith.constant 0.000000e+00 : f32
    %6 = vector.broadcast %cst_5 : f32 to vector<8x128xf32>
    %7 = arith.maximumf %5, %6 : vector<8x128xf32>
    %c0_6 = arith.constant 0 : index
    %c0_7 = arith.constant 0 : index
    %8 = vector.load %arg4[%c0_6, %c0_7] : memref<128x128xf32, #tpu.memory_space<vmem>>, vector<128x128xf32>
    %c0_8 = arith.constant 0 : index
    %c0_9 = arith.constant 0 : index
    %9 = vector.load %arg5[%c0_8, %c0_9] : memref<1x128xf32, #tpu.memory_space<vmem>>, vector<1x128xf32>
    %cst_10 = arith.constant dense<0.000000e+00> : vector<8x128xf32>
    %10 = tpu.matmul %7, %8, %cst_10 {dimension_numbers = #tpu.dot_dimension_numbers<[1], [0], [0], [1], [0, 0, 1, 1], [], []>} : vector<8x128xf32>, vector<128x128xf32>, vector<8x128xf32> -> vector<8x128xf32>
    %11 = vector.broadcast %9 : vector<1x128xf32> to vector<8x128xf32>
    %12 = arith.addf %10, %11 : vector<8x128xf32>
    %cst_11 = arith.constant 0.000000e+00 : f32
    %13 = vector.broadcast %cst_11 : f32 to vector<8x128xf32>
    %14 = arith.maximumf %12, %13 : vector<8x128xf32>
    %c0_12 = arith.constant 0 : index
    %c0_13 = arith.constant 0 : index
    %15 = vector.load %arg6[%c0_12, %c0_13] : memref<8x128xf32, #tpu.memory_space<vmem>>, vector<8x128xf32>
    tpu.vector_store %arg6[%c0_12, %c0_13], %14 {strides = array<i32>} : memref<8x128xf32, #tpu.memory_space<vmem>>, vector<8x128xf32>,
    return
  }
  func.func @transform_0(%arg0: i32) -> (i32, i32) {
    %c0_i32 = arith.constant 0 : i32
    %c0_i32_0 = arith.constant 0 : i32
    return %arg0, %c0_i32 : i32, i32
  }
  func.func @transform_1(%arg0: i32) -> (i32, i32) {
    %c0_i32 = arith.constant 0 : i32
    %c0_i32_0 = arith.constant 0 : i32
    %c0_i32_1 = arith.constant 0 : i32
    return %c0_i32, %c0_i32_0 : i32, i32
  }
  func.func @transform_2(%arg0: i32) -> (i32, i32) {
    %c0_i32 = arith.constant 0 : i32
    %c0_i32_0 = arith.constant 0 : i32
    %c0_i32_1 = arith.constant 0 : i32
    return %c0_i32, %c0_i32_0 : i32, i32
  }
  func.func @transform_3(%arg0: i32) -> (i32, i32) {
    %c0_i32 = arith.constant 0 : i32
    %c0_i32_0 = arith.constant 0 : i32
    %c0_i32_1 = arith.constant 0 : i32
    return %c0_i32, %c0_i32_0 : i32, i32
  }
  func.func @transform_4(%arg0: i32) -> (i32, i32) {
    %c0_i32 = arith.constant 0 : i32
    %c0_i32_0 = arith.constant 0 : i32
    %c0_i32_1 = arith.constant 0 : i32
    return %c0_i32, %c0_i32_0 : i32, i32
  }
  func.func @transform_5(%arg0: i32) -> (i32, i32) {
    %c0_i32 = arith.constant 0 : i32
    %c0_i32_0 = arith.constant 0 : i32
    return %arg0, %c0_i32 : i32, i32
  }
}

</mosaic_0001>

<bundles_post_ra>
// kernel: mlp_forward.1
= control target key start
LH: loop header
LB: loop body
LE: loop exit
PB: predicated region body
PF: predicated region fallthrough
CT: control target
= control target key end

     0   :  { %10 = vsyncpa [#allocation3], 0  ;;  %s488_s0 = inlined_call_operand.vmem [shape: f32[8,128], index: 0, kind: input, shape index: {}]   ;;  %s489_s1 = inlined_call_operand.hbm [shape: f32[128,128], index: 1, kind: input, shape index: {}]   ;;  %s490_s2 = inlined_call_operand.vmem [shape: f32[1,128], index: 2, kind: input, shape index: {}]   ;;  %s491_s3 = inlined_call_operand.hbm [shape: f32[128,128], index: 3, kind: input, shape index: {}]   ;;  %s492_s4 = inlined_call_operand.vmem [shape: f32[1,128], index: 4, kind: input, shape index: {}]   ;;  %s493_s5 = inlined_call_operand.vmem [shape: f32[8,128], index: 5, kind: output, shape index: {}]  }
   0x1   :  { %11 = vsyncpa [#allocation5], 0  ;;  %s400_s18 = smov [#allocation2]  }
   0x2   :  { %s19_s19 = sshll.u32 %s400_s18, 4  ;;  %s20_s19 = int_to_ptr.vmem [resolvable:$true] %s19_s19 }
   0x3   :  { %s364_s20 = scalar_lea.vmem %s20_s19, 2048  ;;  %p369_p1 = scmp.lt.s32.totalorder %s20_s19, %s20_s19 }
   0x4   :  { %p365_p0 = scmp.ne.s32.totalorder %s20_s19, %s364_s20  ;;  %p370_p2 = scmp.lt.s32.totalorder %s364_s20, %s364_s20 }
   0x6   :  { %p371_p3 = por %p370_p2, %p369_p1 }
   0x8   :  { %p372_p4 = pnand %p371_p3, %p365_p0 }
   0xa   :  { %375 = shalt.err (!%p372_p4)
}
   0xb   :  { %s401_s21 = smov 128   ;;  %s402_s22 = smov 8  }
   0xc   :  { %25 = dma.hbm_to_vmem [thread:$0]  %s489_s1, 2048, %s20_s19, [#allocation3], %s401_s21, %s401_s21, %s402_s22  }
   0xd   :  { %s403_s25 = smov [#allocation4]  }
   0xe   :  { %s33_s26 = sshll.u32 %s403_s25, 4  ;;  %s34_s26 = int_to_ptr.vmem [resolvable:$true] %s33_s26 }
   0xf   :  { %s384_s27 = scalar_lea.vmem %s34_s26, 2048  ;;  %p389_p6 = scmp.lt.s32.totalorder %s34_s26, %s34_s26 }
  0x10   :  { %p385_p5 = scmp.ne.s32.totalorder %s34_s26, %s384_s27  ;;  %p390_p7 = scmp.lt.s32.totalorder %s384_s27, %s384_s27 }
  0x12   :  { %p391_p8 = por %p390_p7, %p389_p6 }
  0x14   :  { %p392_p9 = pnand %p391_p8, %p385_p5 }
  0x16   :  { %395 = shalt.err (!%p392_p9)
}
  0x17   :  { %39 = dma.hbm_to_vmem [thread:$0]  %s491_s3, 2048, %s34_s26, [#allocation5], %s401_s21, %s401_s21, %s402_s22  }
  0x18   :  { %396 = dma.done.wait [#allocation3], 2048  }
  0x19   :  { %397 = vsyncadd [#allocation3], 4294965248 }
  0x1a   :  { %398 = dma.done.wait [#allocation5], 2048  }
  0x1b   :  { %399 = vsyncadd [#allocation5], 4294965248  ;;  %v404_v0 = vmov 0.0   ;;  %vm405_vm0 = vmmov 0   ;;  %v64_v1 = vld [vmem:[#allocation2 + $0x78] sm:$0xff]  ;;  %v63_v2 = vld [vmem:[#allocation2 + $0x70] sm:$0xff] }
  0x1c   :  { %280 = vmatprep.subr.mxu0 %v404_v0  ;;  %312 = vmatprep.mubr.msk.f32.mxu0 %vm405_vm0, %v404_v0  ;;  %v62_v3 = vld [vmem:[#allocation2 + $0x68] sm:$0xff]  ;;  %v61_v4 = vld [vmem:[#allocation2 + $0x60] sm:$0xff]  ;;  %v158_v5 = vld [vmem:[#allocation4 + $0x78] sm:$0xff] }
  0x1d   :  { %315 = vmatprep.subr.mxu1 %v404_v0  ;;  %347 = vmatprep.mubr.msk.f32.mxu1 %vm405_vm0, %v404_v0  ;;  %v60_v6 = vld [vmem:[#allocation2 + $0x58] sm:$0xff]  ;;  %v157_v7 = vld [vmem:[#allocation4 + $0x70] sm:$0xff]  ;;  %v156_v8 = vld [vmem:[#allocation4 + $0x68] sm:$0xff] }
  0x1e   :  { %281 = vmatpush3.msra.mxu0 %v64_v1  ;;  %316 = vmatpush3.msra.mxu1 %v158_v5  ;;  %v59_v9 = vld [vmem:[#allocation2 + $0x50] sm:$0xff]  ;;  %v155_v10 = vld [vmem:[#allocation4 + $0x60] sm:$0xff]  ;;  %v58_v11 = vld [vmem:[#allocation2 + $0x48] sm:$0xff] }
  0x1f   :  { %282 = vmatprep.subr.mxu0 %v404_v0  ;;  %317 = vmatprep.subr.mxu1 %v404_v0  ;;  %v154_v12 = vld [vmem:[#allocation4 + $0x58] sm:$0xff]  ;;  %v57_v13 = vld [vmem:[#allocation2 + $0x40] sm:$0xff]  ;;  %v153_v14 = vld [vmem:[#allocation4 + $0x50] sm:$0xff] }
  0x20   :  { %283 = vmatpush3.msra.mxu0 %v63_v2  ;;  %318 = vmatpush3.msra.mxu1 %v157_v7  ;;  %v56_v15 = vld [vmem:[#allocation2 + $0x38] sm:$0xff]  ;;  %v152_v16 = vld [vmem:[#allocation4 + $0x48] sm:$0xff]  ;;  %v55_v17 = vld [vmem:[#allocation2 + $0x30] sm:$0xff] }
  0x21   :  { %284 = vmatprep.subr.mxu0 %v404_v0  ;;  %319 = vmatprep.subr.mxu1 %v404_v0  ;;  %v151_v18 = vld [vmem:[#allocation4 + $0x40] sm:$0xff]  ;;  %v54_v19 = vld [vmem:[#allocation2 + $0x28] sm:$0xff]  ;;  %v150_v20 = vld [vmem:[#allocation4 + $0x38] sm:$0xff] }
  0x22   :  { %285 = vmatpush3.msra.mxu0 %v62_v3  ;;  %320 = vmatpush3.msra.mxu1 %v156_v8  ;;  %v53_v21 = vld [vmem:[#allocation2 + $0x20] sm:$0xff]  ;;  %v149_v22 = vld [vmem:[#allocation4 + $0x30] sm:$0xff]  ;;  %v52_v23 = vld [vmem:[#allocation2 + $0x18] sm:$0xff] }
  0x23   :  { %286 = vmatprep.subr.mxu0 %v404_v0  ;;  %321 = vmatprep.subr.mxu1 %v404_v0  ;;  %v148_v24 = vld [vmem:[#allocation4 + $0x28] sm:$0xff]  ;;  %v51_v25 = vld [vmem:[#allocation2 + $0x10] sm:$0xff]  ;;  %v147_v26 = vld [vmem:[#allocation4 + $0x20] sm:$0xff] }
  0x24   :  { %287 = vmatpush3.msra.mxu0 %v61_v4  ;;  %322 = vmatpush3.msra.mxu1 %v155_v10  ;;  %v50_v27 = vld [vmem:[#allocation2 + $0x8] sm:$0xff]  ;;  %v146_v28 = vld [vmem:[#allocation4 + $0x18] sm:$0xff]  ;;  %v49_v29 = vld [vmem:[#allocation2] sm:$0xff] }
  0x25   :  { %288 = vmatprep.subr.mxu0 %v404_v0  ;;  %323 = vmatprep.subr.mxu1 %v404_v0  ;;  %v48_v30 = vld [vmem:[%s488_s0] sm:$0xff]  ;;  %v145_v31 = vld [vmem:[#allocation4 + $0x10] sm:$0xff]  ;;  %v144_v32 = vld [vmem:[#allocation4 + $0x8] sm:$0xff] }
  0x26   :  { %289 = vmatpush3.msra.mxu0 %v60_v6  ;;  %324 = vmatpush3.msra.mxu1 %v154_v12  ;;  %v143_v33 = vld [vmem:[#allocation4] sm:$0xff] }
  0x27   :  { %290 = vmatprep.subr.mxu0 %v404_v0  ;;  %325 = vmatprep.subr.mxu1 %v404_v0  ;;  %v244_v34 = vld [vmem:[%s490_s2] ss:$0 sm:$0xff] }
  0x28   :  { %291 = vmatpush3.msra.mxu0 %v59_v9  ;;  %326 = vmatpush3.msra.mxu1 %v153_v14  ;;  %v245_v39 = vld [vmem:[%s492_s4] ss:$0 sm:$0xff] }
  0x29   :  { %292 = vmatprep.subr.mxu0 %v404_v0  ;;  %327 = vmatprep.subr.mxu1 %v404_v0 }
  0x2a   :  { %293 = vmatpush3.msra.mxu0 %v58_v11  ;;  %328 = vmatpush3.msra.mxu1 %v152_v16 }
  0x2b   :  { %294 = vmatprep.subr.mxu0 %v404_v0  ;;  %329 = vmatprep.subr.mxu1 %v404_v0 }
  0x2c   :  { %295 = vmatpush3.msra.mxu0 %v57_v13  ;;  %330 = vmatpush3.msra.mxu1 %v151_v18 }
  0x2d   :  { %296 = vmatprep.subr.mxu0 %v404_v0  ;;  %331 = vmatprep.subr.mxu1 %v404_v0 }
  0x2e   :  { %297 = vmatpush3.msra.mxu0 %v56_v15  ;;  %332 = vmatpush3.msra.mxu1 %v150_v20 }
  0x2f   :  { %298 = vmatprep.subr.mxu0 %v404_v0  ;;  %333 = vmatprep.subr.mxu1 %v404_v0 }
  0x30   :  { %299 = vmatpush3.msra.mxu0 %v55_v17  ;;  %334 = vmatpush3.msra.mxu1 %v149_v22 }
  0x31   :  { %300 = vmatprep.subr.mxu0 %v404_v0  ;;  %335 = vmatprep.subr.mxu1 %v404_v0 }
  0x32   :  { %301 = vmatpush3.msra.mxu0 %v54_v19  ;;  %336 = vmatpush3.msra.mxu1 %v148_v24 }
  0x33   :  { %302 = vmatprep.subr.mxu0 %v404_v0  ;;  %337 = vmatprep.subr.mxu1 %v404_v0 }
  0x34   :  { %303 = vmatpush3.msra.mxu0 %v53_v21  ;;  %338 = vmatpush3.msra.mxu1 %v147_v26 }
  0x35   :  { %304 = vmatprep.subr.mxu0 %v404_v0  ;;  %339 = vmatprep.subr.mxu1 %v404_v0 }
  0x36   :  { %305 = vmatpush3.msra.mxu0 %v52_v23  ;;  %340 = vmatpush3.msra.mxu1 %v146_v28 }
  0x37   :  { %306 = vmatprep.subr.mxu0 %v404_v0  ;;  %341 = vmatprep.subr.mxu1 %v404_v0 }
  0x38   :  { %307 = vmatpush3.msra.mxu0 %v51_v25  ;;  %342 = vmatpush3.msra.mxu1 %v145_v31 }
  0x39   :  { %308 = vmatprep.subr.mxu0 %v404_v0  ;;  %343 = vmatprep.subr.mxu1 %v404_v0 }
  0x3a   :  { %309 = vmatpush3.msra.mxu0 %v50_v27  ;;  %344 = vmatpush3.msra.mxu1 %v144_v32 }
  0x3b   :  { %310 = vmatprep.subr.mxu0 %v404_v0  ;;  %345 = vmatprep.subr.mxu1 %v404_v0 }
  0x3c   :  { %311 = vmatpush3.msra.mxu0 %v49_v29  ;;  %346 = vmatpush3.msra.mxu1 %v143_v33 }
  0x3d   :  { %313 = vmatmul.mubr.f32.vlgmr.msra.gmra.mxu0 %v48_v30 }
  0xfd   :  { %v138_v35 = vpop.f32.mrf.mxu0 }
  0xfe   :  { %v139_v36 = vadd.f32 %v244_v34, %v138_v35 }
  0xff   :  { %v314_v37 = vpop.f32.mrf.mxu0 }
 0x100   :  { %v142_v38 = vmax.f32 %v139_v36, 0.0 }
 0x102   :  { %348 = vmatmul.mubr.f32.vlgmr.msra.gmra.mxu1 %v142_v38 }
 0x1c2   :  { %v232_v40 = vpop.f32.mrf.mxu1 }
 0x1c3   :  { %v233_v41 = vadd.f32 %v245_v39, %v232_v40 }
 0x1c4   :  { %v349_v42 = vpop.f32.mrf.mxu1 }
 0x1c5   :  { %v236_v43 = vmax.f32 %v233_v41, 0.0 }
 0x1c7   :  { %237 = vst [vmem:[%s493_s5] sm:$0xff] %v236_v43 }
 0x1c8   :  { %242 = vsyncpa [#allocation3], 1 }
 0x1c9   :  { %243 = vsyncpa [#allocation5], 1 }

</bundles_post_ra>
